<compile_context>
chip_gen: v5e
topology: v5e:2x2
jax: 0.10.0
libtpu: 0.0.40
codegen_flags: <defaults>
</compile_context>

<pallas_src>
import functools

import jax
import jax.numpy as jnp
from jax.experimental import pallas as pl
from jax.experimental.pallas import tpu as pltpu

_LANES = 128


def _round_up(x, m):
    return ((x + m - 1) // m) * m


def _cdiv(a, b):
    return -(-a // b)


def _device_kind():
    try:
        return jax.devices()[0].device_kind.lower()
    except Exception:
        return ""


def _default_block_rows():
    kind = _device_kind()
    if "v7" in kind:
        return 8192   # 3.2 TB/s HBM: ~4 MiB/input/step to hide grid overhead
    if "v5" in kind:
        return 2048   # smaller scoped-VMEM budget; already ~88% of roofline
    return 4096       # v6e and generic fallback


def _default_num_splits():
    # v7x has 2 TensorCores per chip; earlier generations have 1 (split = waste).
    return 2 if "v7" in _device_kind() else 1


def _weighted_l2_kernel(pred_ref, targ_ref, out_ref, *,
                        rows_per_block, blocks_per_split, n_valid_rows):
    """Accumulate sum((pred - targ)^2) over row tiles of a [rows, 128] view.

    Grid = (num_splits, blocks_per_split).  Axis 0 is "parallel" (one split per
    TensorCore on v7x); axis 1 walks that split's row blocks.  out_ref is the
    split's resident (1, 8, 128) f32 partial-sum slab.
    """
    i = pl.program_id(1)

    @pl.when(i == 0)
    def _():
        out_ref[...] = jnp.zeros_like(out_ref)

    diff = pred_ref[...].astype(jnp.float32) - targ_ref[...].astype(jnp.float32)
    sq = diff * diff  # elementwise L2 (mse, reduction='none')

    # Logical position of this block in the flat row space.  It can run past
    # n_valid_rows for the padded tail of the last block, or for over-covered
    # steps of the last split; those rows are masked to zero below.
    block_idx = pl.program_id(0) * blocks_per_split + i
    row_start = block_idx * rows_per_block
    is_full = row_start + rows_per_block <= n_valid_rows

    @pl.when(is_full)
    def _():
        # Fold (rows_per_block, 128) -> (8, 128) with pure VPU adds
        # (layout-preserving sublane-major split; no per-step XLU reduce).
        out_ref[...] += jnp.sum(sq.reshape(-1, 8, _LANES), axis=0).reshape(1, 8, _LANES)

    @pl.when(jnp.logical_not(is_full))
    def _():
        rows = jax.lax.broadcasted_iota(jnp.int32, sq.shape, 0) + row_start
        masked = jnp.where(rows < n_valid_rows, sq, 0.0)
        out_ref[...] += jnp.sum(masked.reshape(-1, 8, _LANES), axis=0).reshape(1, 8, _LANES)


def weighted_loss(pred, targ, weights=1.0, *, block_rows=None, num_splits=None):
    """Pallas equivalent of WeightedLoss.forward (WeightedL2 variant).

    pred, targ: same-shape arrays (e.g. [batch, action_dim]); weights: scalar
    (Python number or traced scalar).  Returns a scalar float32 loss.
    """
    assert pred.shape == targ.shape, (pred.shape, targ.shape)

    w = jnp.asarray(weights, dtype=jnp.float32)
    if w.size != 1:
        raise ValueError("only scalar weights are supported by this kernel")

    total = int(pred.size)
    itemsize = jnp.dtype(pred.dtype).itemsize
    sub_mult = 8 * max(1, 4 // max(itemsize, 1))   # 8 f32 / 16 bf16 / 32 int8
    base = _LANES * sub_mult

    if block_rows is None:
        block_rows = _default_block_rows()
    if num_splits is None:
        num_splits = _default_num_splits()

    # Lane-dense [rows, 128] view.  Only pad up to the next (sub_mult * 128)
    # multiple when the element count requires it (small, rarely triggered);
    # the big round-up to whole tiles is handled by in-kernel masking instead.
    padded_total = _round_up(total, base)

    def _prep(x):
        flat = x.reshape(-1)
        if padded_total != total:
            # TODO(synk): a 1-D BlockSpec with element-granularity masking
            # would make this fully zero-copy; the pad only fires when
            # total % (sub_mult*128) != 0 and adds < sub_mult*128 zeros.
            flat = jnp.pad(flat, (0, padded_total - total))  # zeros: 0 loss
        return flat.reshape(padded_total // _LANES, _LANES)

    pred2 = _prep(pred)
    targ2 = _prep(targ)
    n_rows = padded_total // _LANES                 # multiple of sub_mult

    rows_per_block = min(_round_up(block_rows, sub_mult), n_rows)
    total_blocks = _cdiv(n_rows, rows_per_block)
    num_splits = max(1, min(int(num_splits), total_blocks))
    blocks_per_split = _cdiv(total_blocks, num_splits)
    last_block = total_blocks - 1

    def in_map(c, i):
        # Clamp so over-covered steps of the last split never request an
        # out-of-range block (their contribution is masked to zero in-kernel).
        return (jnp.minimum(c * blocks_per_split + i, last_block), 0)

    block_bytes = rows_per_block * _LANES * itemsize
    pipeline_bytes = 2 * 2 * block_bytes            # 2 inputs x double buffer
    vmem_limit = min(64 << 20, max(32 << 20, 2 * pipeline_bytes))

    kernel = functools.partial(
        _weighted_l2_kernel,
        rows_per_block=rows_per_block,
        blocks_per_split=blocks_per_split,
        n_valid_rows=n_rows,
    )

    partials = pl.pallas_call(
        kernel,
        out_shape=jax.ShapeDtypeStruct((num_splits, 8, _LANES), jnp.float32),
        grid_spec=pltpu.PrefetchScalarGridSpec(
            num_scalar_prefetch=0,
            grid=(num_splits, blocks_per_split),
            in_specs=[
                pl.BlockSpec((rows_per_block, _LANES), in_map),   # pred tile
                pl.BlockSpec((rows_per_block, _LANES), in_map),   # targ tile
            ],
            # Resident per-split partial-sum slab (vreg-shaped, lane-dense).
            out_specs=pl.BlockSpec((1, 8, _LANES), lambda c, i: (c, 0, 0)),
        ),
        compiler_params=pltpu.CompilerParams(
            dimension_semantics=("parallel", "arbitrary"),
            vmem_limit_bytes=vmem_limit,
        ),
    )(pred2, targ2)

    inv_total = 1.0 / float(total)                   # mean over real elements
    return jnp.sum(partials) * (w.reshape(()) * jnp.float32(inv_total))


def _reference(pred, targ, weights=1.0):
    loss = (pred.astype(jnp.float32) - targ.astype(jnp.float32)) ** 2
    return (loss * jnp.float32(weights)).mean()


if __name__ == "__main__":
    key = jax.random.PRNGKey(0)
    k1, k2, k3, k4, k5, k6 = jax.random.split(key, 6)

    # 1) Docstring-scale case [batch x action_dim]; total=512 exercises the
    #    small-pad path (total not a multiple of sub_mult*128) with one block.
    batch, action_dim = 16, 32
    pred = jax.random.normal(k1, (batch, action_dim), dtype=jnp.float32)
    targ = jax.random.normal(k2, (batch, action_dim), dtype=jnp.float32)
    out = jax.block_until_ready(weighted_loss(pred, targ, 1.0))
    ref = jax.block_until_ready(_reference(pred, targ, 1.0))
    assert jnp.allclose(out, ref, rtol=1e-5, atol=1e-6), (out, ref)

    # 2) Multi-step grid with a partial last block, a forced 2-way split and a
    #    non-unit scalar weight: total=30720 -> 240 rows, 96-row blocks ->
    #    3 valid blocks (last one partial) + 1 over-covered block on split 1.
    #    Exercises the parallel split, the tail mask, and the index clamp on
    #    every generation.
    batch2, action_dim2 = 640, 48
    pred2 = jax.random.normal(k3, (batch2, action_dim2), dtype=jnp.float32)
    targ2 = jax.random.normal(k4, (batch2, action_dim2), dtype=jnp.float32)
    out2 = jax.block_until_ready(
        weighted_loss(pred2, targ2, 0.5, block_rows=96, num_splits=2))
    ref2 = jax.block_until_ready(_reference(pred2, targ2, 0.5))
    assert jnp.allclose(out2, ref2, rtol=1e-4, atol=1e-5), (out2, ref2)

    # 3) bf16 inputs (16-row sublane packing) with default tiling.
    pred3 = jax.random.normal(k5, (128, 32), dtype=jnp.bfloat16)
    targ3 = jax.random.normal(k6, (128, 32), dtype=jnp.bfloat16)
    out3 = jax.block_until_ready(weighted_loss(pred3, targ3, 2.0))
    ref3 = jax.block_until_ready(_reference(pred3, targ3, 2.0))
    assert jnp.allclose(out3, ref3, rtol=1e-3, atol=1e-4), (out3, ref3)

    print("KERNEL_OK")
</pallas_src>

<mosaic_0001>
module attributes {stable_mosaic.version = 11 : i64} {
  func.func @_weighted_l2_kernel(%arg0: i32, %arg1: i32, %arg2: memref<8x128xf32, #tpu.memory_space<vmem>>, %arg3: memref<8x128xf32, #tpu.memory_space<vmem>>, %arg4: memref<1x8x128xf32, #tpu.memory_space<vmem>>) attributes {dimension_semantics = [#tpu.dimension_semantics<parallel>, #tpu.dimension_semantics<arbitrary>], iteration_bounds = array<i64: 1, 1>, scalar_prefetch = 0 : i64, scratch_operands = 0 : i64, tpu.core_type = #tpu.core_type<tc>, window_params = [{transform_indices = @transform_0, window_bounds = array<i64: 8, 128>}, {transform_indices = @transform_1, window_bounds = array<i64: 8, 128>}, {transform_indices = @transform_2, window_bounds = array<i64: 1, 8, 128>}]} {
    %c0_i32 = arith.constant 0 : i32
    %0 = arith.cmpi eq, %arg1, %c0_i32 : i32
    %1 = arith.extui %0 : i1 to i32
    %c0_i32_0 = arith.constant 0 : i32
    %2 = arith.cmpi ne, %1, %c0_i32_0 : i32
    scf.if %2 {
      %cst = arith.constant 0.000000e+00 : f32
      %17 = vector.broadcast %cst : f32 to vector<1x8x128xf32>
      %c0_8 = arith.constant 0 : index
      %c0_9 = arith.constant 0 : index
      %c0_10 = arith.constant 0 : index
      %18 = vector.load %arg4[%c0_8, %c0_9, %c0_10] : memref<1x8x128xf32, #tpu.memory_space<vmem>>, vector<1x8x128xf32>
      tpu.vector_store %arg4[%c0_8, %c0_9, %c0_10], %17 {strides = array<i32>} : memref<1x8x128xf32, #tpu.memory_space<vmem>>, vector<1x8x128xf32>,
    } else {
    }
    %c0 = arith.constant 0 : index
    %c0_1 = arith.constant 0 : index
    %3 = vector.load %arg2[%c0, %c0_1] : memref<8x128xf32, #tpu.memory_space<vmem>>, vector<8x128xf32>
    %c0_2 = arith.constant 0 : index
    %c0_3 = arith.constant 0 : index
    %4 = vector.load %arg3[%c0_2, %c0_3] : memref<8x128xf32, #tpu.memory_space<vmem>>, vector<8x128xf32>
    %5 = arith.subf %3, %4 : vector<8x128xf32>
    %6 = arith.mulf %5, %5 : vector<8x128xf32>
    %c1_i32 = arith.constant 1 : i32
    %7 = arith.muli %arg0, %c1_i32 : i32
    %8 = arith.addi %7, %arg1 : i32
    %c8_i32 = arith.constant 8 : i32
    %9 = arith.muli %8, %c8_i32 : i32
    %c8_i32_4 = arith.constant 8 : i32
    %10 = arith.addi %9, %c8_i32_4 : i32
    %c8_i32_5 = arith.constant 8 : i32
    %11 = arith.cmpi sle, %10, %c8_i32_5 : i32
    %12 = arith.extui %11 : i1 to i32
    %c0_i32_6 = arith.constant 0 : i32
    %13 = arith.cmpi ne, %12, %c0_i32_6 : i32
    scf.if %13 {
      %c0_8 = arith.constant 0 : index
      %c0_9 = arith.constant 0 : index
      %c0_10 = arith.constant 0 : index
      %17 = vector.load %arg4[%c0_8, %c0_9, %c0_10] : memref<1x8x128xf32, #tpu.memory_space<vmem>>, vector<1x8x128xf32>
      %18 = vector.shape_cast %6 : vector<8x128xf32> to vector<1x8x128xf32>
      %cst = arith.constant dense<0.000000e+00> : vector<8x128xf32>
      %19 = vector.multi_reduction <add>, %18, %cst [0] : vector<1x8x128xf32> to vector<8x128xf32>
      %20 = vector.shape_cast %19 : vector<8x128xf32> to vector<1x8x128xf32>
      %21 = arith.addf %17, %20 : vector<1x8x128xf32>
      %c0_11 = arith.constant 0 : index
      %c0_12 = arith.constant 0 : index
      %c0_13 = arith.constant 0 : index
      %22 = vector.load %arg4[%c0_11, %c0_12, %c0_13] : memref<1x8x128xf32, #tpu.memory_space<vmem>>, vector<1x8x128xf32>
      tpu.vector_store %arg4[%c0_11, %c0_12, %c0_13], %21 {strides = array<i32>} : memref<1x8x128xf32, #tpu.memory_space<vmem>>, vector<1x8x128xf32>,
    } else {
    }
    %true = arith.constant true
    %14 = arith.xori %11, %true : i1
    %15 = arith.extui %14 : i1 to i32
    %c0_i32_7 = arith.constant 0 : i32
    %16 = arith.cmpi ne, %15, %c0_i32_7 : i32
    scf.if %16 {
      %17 = tpu.iota {dimensions = array<i32: 0>} : vector<8x128xi32>
      %18 = vector.broadcast %9 : i32 to vector<8x128xi32>
      %19 = arith.addi %17, %18 : vector<8x128xi32>
      %c8_i32_8 = arith.constant 8 : i32
      %20 = vector.broadcast %c8_i32_8 : i32 to vector<8x128xi32>
      %21 = arith.cmpi slt, %19, %20 : vector<8x128xi32>
      %cst = arith.constant 0.000000e+00 : f32
      %22 = vector.broadcast %cst : f32 to vector<8x128xf32>
      %23 = arith.select %21, %6, %22 : vector<8x128xi1>, vector<8x128xf32>
      %c0_9 = arith.constant 0 : index
      %c0_10 = arith.constant 0 : index
      %c0_11 = arith.constant 0 : index
      %24 = vector.load %arg4[%c0_9, %c0_10, %c0_11] : memref<1x8x128xf32, #tpu.memory_space<vmem>>, vector<1x8x128xf32>
      %25 = vector.shape_cast %23 : vector<8x128xf32> to vector<1x8x128xf32>
      %cst_12 = arith.constant dense<0.000000e+00> : vector<8x128xf32>
      %26 = vector.multi_reduction <add>, %25, %cst_12 [0] : vector<1x8x128xf32> to vector<8x128xf32>
      %27 = vector.shape_cast %26 : vector<8x128xf32> to vector<1x8x128xf32>
      %28 = arith.addf %24, %27 : vector<1x8x128xf32>
      %c0_13 = arith.constant 0 : index
      %c0_14 = arith.constant 0 : index
      %c0_15 = arith.constant 0 : index
      %29 = vector.load %arg4[%c0_13, %c0_14, %c0_15] : memref<1x8x128xf32, #tpu.memory_space<vmem>>, vector<1x8x128xf32>
      tpu.vector_store %arg4[%c0_13, %c0_14, %c0_15], %28 {strides = array<i32>} : memref<1x8x128xf32, #tpu.memory_space<vmem>>, vector<1x8x128xf32>,
    } else {
    }
    return
  }
  func.func @transform_0(%arg0: i32, %arg1: i32) -> (i32, i32) {
    %c1_i32 = arith.constant 1 : i32
    %0 = arith.muli %arg0, %c1_i32 : i32
    %1 = arith.addi %0, %arg1 : i32
    %c0_i32 = arith.constant 0 : i32
    %2 = arith.minsi %1, %c0_i32 : i32
    %c0_i32_0 = arith.constant 0 : i32
    %c0_i32_1 = arith.constant 0 : i32
    return %2, %c0_i32_0 : i32, i32
  }
  func.func @transform_1(%arg0: i32, %arg1: i32) -> (i32, i32) {
    %c1_i32 = arith.constant 1 : i32
    %0 = arith.muli %arg0, %c1_i32 : i32
    %1 = arith.addi %0, %arg1 : i32
    %c0_i32 = arith.constant 0 : i32
    %2 = arith.minsi %1, %c0_i32 : i32
    %c0_i32_0 = arith.constant 0 : i32
    %c0_i32_1 = arith.constant 0 : i32
    return %2, %c0_i32_0 : i32, i32
  }
  func.func @transform_2(%arg0: i32, %arg1: i32) -> (i32, i32, i32) {
    %c0_i32 = arith.constant 0 : i32
    %c0_i32_0 = arith.constant 0 : i32
    %c0_i32_1 = arith.constant 0 : i32
    return %arg0, %c0_i32, %c0_i32_0 : i32, i32, i32
  }
}

</mosaic_0001>

<bundles_post_ra>
// kernel: tpu_custom_call.1
= control target key start
LH: loop header
LB: loop body
LE: loop exit
PB: predicated region body
PF: predicated region fallthrough
CT: control target
= control target key end

     0   :  { %7 = vsyncpa [#allocation3], 0  ;;  %s221_s0 = inlined_call_operand.hbm [shape: f32[8,128], index: 0, kind: input, shape index: {}]   ;;  %s222_s1 = inlined_call_operand.hbm [shape: f32[8,128], index: 1, kind: input, shape index: {}]   ;;  %s223_s2 = inlined_call_operand.hbm [shape: f32[1,8,128], index: 2, kind: output, shape index: {}]  }
   0x1   :  { %8 = vsyncpa [#allocation6], 0 }
   0x2   :  { %9 = vsyncpa [#allocation4], 0  ;;  %s20_s11 = sshll.u32 %s221_s0, 4  ;;  %s194_s12 = smov [#allocation2]   ;;  %s21_s11 = int_to_ptr.hbm [resolvable:$true] %s20_s11 }
   0x3   :  { %s22_s13 = sshll.u32 %s194_s12, 4  ;;  %s36_s16 = sshll.u32 %s222_s1, 4  ;;  %s23_s13 = int_to_ptr.vmem [resolvable:$true] %s22_s13  ;;  %s37_s16 = int_to_ptr.hbm [resolvable:$true] %s36_s16 }
   0x4   :  { %25 = dma.hbm_to_vmem [thread:$0]  %s21_s11, 128, %s23_s13, [#allocation3]  }
   0x5   :  { %s195_s17 = smov [#allocation5]  }
   0x6   :  { %s38_s18 = sshll.u32 %s195_s17, 4  ;;  %s39_s18 = int_to_ptr.vmem [resolvable:$true] %s38_s18 }
   0x7   :  { %41 = dma.hbm_to_vmem [thread:$0]  %s37_s16, 128, %s39_s18, [#allocation6]  }
   0x8   :  { %188 = dma.done.wait [#allocation3], 128  }
   0x9   :  { %189 = vsyncadd [#allocation3], 4294967168 }
   0xa   :  { %190 = dma.done.wait [#allocation6], 128  }
   0xb   :  { %191 = vsyncadd [#allocation6], 4294967168  ;;  %v61_v0 = vld [vmem:[#allocation2] sm:$0xff]  ;;  %v62_v1 = vld [vmem:[#allocation5] sm:$0xff]  ;;  %s196_s0 = smov [#allocation7]   ;;  %s97_s22 = sshll.u32 %s223_s2, 4  ;;  %s98_s22 = int_to_ptr.hbm [resolvable:$true] %s97_s22 }
   0xc   :  { %v63_v2 = vsub.f32 %v61_v0, %v62_v1  ;;  %s95_s19 = sshll.u32 %s196_s0, 4  ;;  %s96_s19 = int_to_ptr.vmem [resolvable:$true] %s95_s19 }
   0xe   :  { %v64_v3 = vmul.f32 %v63_v2, %v63_v2 }
  0x10   :  { %75 = vst [vmem:[#allocation7] sm:$0xff] %v64_v3 }
  0x11   :  { %100 = dma.vmem_to_hbm [thread:$0]  %s96_s19, 128, %s98_s22, [#allocation4]  }
  0x12   :  { %192 = dma.done.wait [#allocation4], 128  }
  0x13   :  { %193 = vsyncadd [#allocation4], 4294967168 }
  0x14   :  { %105 = vsyncpa [#allocation3], 1 }
  0x15   :  { %106 = vsyncpa [#allocation6], 1 }
  0x16   :  { %107 = vsyncpa [#allocation4], 1 }

</bundles_post_ra>
